<compile_context>
chip_gen: v7x
topology: tpu7x:2x2x1
jax: 0.10.0
libtpu: 0.0.40
codegen_flags: <defaults>
</compile_context>

<pallas_src>
import jax
import jax.numpy as jnp
from jax.experimental import pallas as pl
from jax.experimental.pallas import tpu as pltpu


def ms_block_forward(x_nchw, conv_weight, conv_bias, pool_level, txt_length):
    """Pallas implementation of MS_Block.forward.

    x_nchw:      (N, C_in, H, W) float32  (PyTorch NCHW)
    conv_weight: (C_out, C_in, 1, 1)
    conv_bias:   (C_out,)
    returns:     (N, C_out, txt_length, 1) float32
    """
    N, C_in, H, W = x_nchw.shape
    C_out = conv_weight.shape[0]
    k = 5 * pool_level
    Hp = H // k            # AvgPool2d ceil_mode=False -> floor
    T = txt_length
    if Hp < 1:
        raise ValueError(f"H={H} must be >= pooling window {k} (got Hp={Hp}).")

    # Nearest-neighbour mapping src[t] = floor(t * Hp / T) is non-decreasing,
    # so each pooled row i is replicated into a contiguous run of cnt[i]
    # output rows.  All static Python ints -> no index arrays in the kernel.
    src = [(t * Hp) // T for t in range(T)]
    cnt = [src.count(i) for i in range(Hp)]

    # Only column w=0 reaches the output (nearest resize to width 1); pool /
    # 1x1 conv / ReLU act per column, so drop the rest before the kernel.
    x = x_nchw[:, :, :, 0]                                    # (N, C_in, H)
    w = conv_weight.reshape(C_out, C_in).astype(jnp.float32)  # (C_out, C_in)
    b = conv_bias.reshape(C_out, 1).astype(jnp.float32)       # (C_out, 1)

    def kernel(x_ref, w_ref, b_ref, o_ref):
        # x_ref: (N, C_in, H)   channels on sublanes, H on lanes
        # w_ref: (C_out, C_in)  1x1 conv weight
        # b_ref: (C_out, 1)
        # o_ref: (N, C_out, T)  final layout (minus trailing W=1)
        wv = w_ref[...]
        bv = b_ref[...]
        inv_k = jnp.float32(1.0 / k)
        for n in range(N):                       # unrolled; one invocation total
            xn = x_ref[n].astype(jnp.float32)    # (C_in, H)
            # --- AvgPool over H (lane axis): static windows, lane reduces ---
            cols = [
                jnp.sum(xn[:, i * k:(i + 1) * k], axis=-1, keepdims=True)
                for i in range(Hp)
            ]
            pooled = jnp.concatenate(cols, axis=-1) * inv_k          # (C_in, Hp)
            # --- 1x1 conv (the only MXU op) + bias + ReLU ---
            y = jnp.dot(wv, pooled, preferred_element_type=jnp.float32)
            y = jnp.maximum(y + bv, 0.0)                             # (C_out, Hp)
            # --- nearest upsample Hp -> T: lane broadcasts + concat ---
            segs = [
                jnp.broadcast_to(y[:, i:i + 1], (C_out, cnt[i]))
                for i in range(Hp) if cnt[i] > 0
            ]
            o_ref[n] = jnp.concatenate(segs, axis=-1).astype(o_ref.dtype)

    vmem = pl.BlockSpec(memory_space=pltpu.MemorySpace.VMEM)   # whole array in VMEM
    out = pl.pallas_call(
        kernel,
        out_shape=jax.ShapeDtypeStruct((N, C_out, T), jnp.float32),
        in_specs=[vmem, vmem, vmem],
        out_specs=vmem,
    )(x, w, b)                                                  # (N, C_out, T)

    # Final NCHW: (N, C_out, txt_length, 1) - trailing singleton is a free reshape.
    return out[..., None]


def _reference_forward(x_nchw, conv_weight, conv_bias, pool_level, txt_length):
    """Pure-JAX reference mirroring the PyTorch module (for sanity check)."""
    N, C_in, H, W = x_nchw.shape
    C_out = conv_weight.shape[0]
    k = 5 * pool_level
    Hp = H // k
    # AvgPool2d over H only
    xp = x_nchw[:, :, :Hp * k, :].reshape(N, C_in, Hp, k, W).mean(axis=3)
    # 1x1 conv
    wmat = conv_weight.reshape(C_out, C_in)
    y = jnp.einsum("oc,nchw->nohw", wmat, xp) + conv_bias[None, :, None, None]
    y = jnp.maximum(y, 0.0)
    # nearest interpolate to (txt_length, 1)
    src_h = (jnp.arange(txt_length) * Hp) // txt_length
    src_w = (jnp.arange(1) * W) // 1
    return y[:, :, src_h, :][:, :, :, src_w]


if __name__ == "__main__":
    # Small shapes consistent with the module (text branch: W=1, H=txt_length).
    N, C_in, C_out = 2, 4, 8
    pool_level = 1          # pool kernel/stride = (5, 1)
    txt_length = 20
    H, W = txt_length, 1

    key = jax.random.PRNGKey(0)
    kx, kw = jax.random.split(key)
    x = jax.random.normal(kx, (N, C_in, H, W), dtype=jnp.float32)
    # _init_weight: conv weight ~ Normal(0, 0.01), bias = 0
    conv_weight = 0.01 * jax.random.normal(kw, (C_out, C_in, 1, 1), dtype=jnp.float32)
    conv_bias = jnp.zeros((C_out,), dtype=jnp.float32)

    out = ms_block_forward(x, conv_weight, conv_bias, pool_level, txt_length)
    out = jax.block_until_ready(out)

    ref = _reference_forward(x, conv_weight, conv_bias, pool_level, txt_length)
    assert out.shape == (N, C_out, txt_length, 1), out.shape
    assert jnp.allclose(out, ref, atol=1e-5, rtol=1e-5), "mismatch vs reference"

    print("KERNEL_OK")
</pallas_src>

<mosaic_0001>
module attributes {stable_mosaic.version = 11 : i64} {
  func.func @kernel(%arg0: memref<2x4x20xf32, #tpu.memory_space<vmem>>, %arg1: memref<8x4xf32, #tpu.memory_space<vmem>>, %arg2: memref<8x1xf32, #tpu.memory_space<vmem>>, %arg3: memref<2x8x20xf32, #tpu.memory_space<vmem>>) attributes {dimension_semantics = [], scalar_prefetch = 0 : i64, scratch_operands = 0 : i64, tpu.core_type = #tpu.core_type<tc>} {
    %c0 = arith.constant 0 : index
    %c0_0 = arith.constant 0 : index
    %0 = vector.load %arg1[%c0, %c0_0] : memref<8x4xf32, #tpu.memory_space<vmem>>, vector<8x4xf32>
    %c0_1 = arith.constant 0 : index
    %c0_2 = arith.constant 0 : index
    %1 = vector.load %arg2[%c0_1, %c0_2] : memref<8x1xf32, #tpu.memory_space<vmem>>, vector<8x1xf32>
    %c0_3 = arith.constant 0 : index
    %c0_4 = arith.constant 0 : index
    %c0_5 = arith.constant 0 : index
    %2 = vector.load %arg0[%c0_3, %c0_4, %c0_5] : memref<2x4x20xf32, #tpu.memory_space<vmem>>, vector<1x4x20xf32>
    %3 = vector.shape_cast %2 : vector<1x4x20xf32> to vector<4x20xf32>
    %4 = vector.extract_strided_slice %3 {offsets = [0, 0], sizes = [4, 5], strides = [1, 1]} : vector<4x20xf32> to vector<4x5xf32>
    %cst = arith.constant dense<0.000000e+00> : vector<4xf32>
    %5 = vector.multi_reduction <add>, %4, %cst [1] : vector<4x5xf32> to vector<4xf32>
    %6 = vector.shape_cast %5 : vector<4xf32> to vector<4x1xf32>
    %7 = vector.extract_strided_slice %3 {offsets = [0, 5], sizes = [4, 5], strides = [1, 1]} : vector<4x20xf32> to vector<4x5xf32>
    %cst_6 = arith.constant dense<0.000000e+00> : vector<4xf32>
    %8 = vector.multi_reduction <add>, %7, %cst_6 [1] : vector<4x5xf32> to vector<4xf32>
    %9 = vector.shape_cast %8 : vector<4xf32> to vector<4x1xf32>
    %10 = vector.extract_strided_slice %3 {offsets = [0, 10], sizes = [4, 5], strides = [1, 1]} : vector<4x20xf32> to vector<4x5xf32>
    %cst_7 = arith.constant dense<0.000000e+00> : vector<4xf32>
    %11 = vector.multi_reduction <add>, %10, %cst_7 [1] : vector<4x5xf32> to vector<4xf32>
    %12 = vector.shape_cast %11 : vector<4xf32> to vector<4x1xf32>
    %13 = vector.extract_strided_slice %3 {offsets = [0, 15], sizes = [4, 5], strides = [1, 1]} : vector<4x20xf32> to vector<4x5xf32>
    %cst_8 = arith.constant dense<0.000000e+00> : vector<4xf32>
    %14 = vector.multi_reduction <add>, %13, %cst_8 [1] : vector<4x5xf32> to vector<4xf32>
    %15 = vector.shape_cast %14 : vector<4xf32> to vector<4x1xf32>
    %16 = tpu.concatenate %6, %9, %12, %15 in 1 : vector<4x1xf32>, vector<4x1xf32>, vector<4x1xf32>, vector<4x1xf32> -> vector<4x4xf32>
    %cst_9 = arith.constant 2.000000e-01 : f32
    %17 = vector.broadcast %cst_9 : f32 to vector<4x4xf32>
    %18 = arith.mulf %16, %17 : vector<4x4xf32>
    %cst_10 = arith.constant dense<0.000000e+00> : vector<8x4xf32>
    %19 = tpu.matmul %0, %18, %cst_10 {dimension_numbers = #tpu.dot_dimension_numbers<[1], [0], [0], [1], [0, 0, 1, 1], [], []>} : vector<8x4xf32>, vector<4x4xf32>, vector<8x4xf32> -> vector<8x4xf32>
    %20 = vector.broadcast %1 : vector<8x1xf32> to vector<8x4xf32>
    %21 = arith.addf %19, %20 : vector<8x4xf32>
    %cst_11 = arith.constant 0.000000e+00 : f32
    %22 = vector.broadcast %cst_11 : f32 to vector<8x4xf32>
    %23 = arith.maximumf %21, %22 : vector<8x4xf32>
    %24 = vector.extract_strided_slice %23 {offsets = [0, 0], sizes = [8, 1], strides = [1, 1]} : vector<8x4xf32> to vector<8x1xf32>
    %25 = vector.shape_cast %24 : vector<8x1xf32> to vector<8x1xf32>
    %26 = vector.broadcast %25 : vector<8x1xf32> to vector<8x5xf32>
    %27 = vector.extract_strided_slice %23 {offsets = [0, 1], sizes = [8, 1], strides = [1, 1]} : vector<8x4xf32> to vector<8x1xf32>
    %28 = vector.shape_cast %27 : vector<8x1xf32> to vector<8x1xf32>
    %29 = vector.broadcast %28 : vector<8x1xf32> to vector<8x5xf32>
    %30 = vector.extract_strided_slice %23 {offsets = [0, 2], sizes = [8, 1], strides = [1, 1]} : vector<8x4xf32> to vector<8x1xf32>
    %31 = vector.shape_cast %30 : vector<8x1xf32> to vector<8x1xf32>
    %32 = vector.broadcast %31 : vector<8x1xf32> to vector<8x5xf32>
    %33 = vector.extract_strided_slice %23 {offsets = [0, 3], sizes = [8, 1], strides = [1, 1]} : vector<8x4xf32> to vector<8x1xf32>
    %34 = vector.shape_cast %33 : vector<8x1xf32> to vector<8x1xf32>
    %35 = vector.broadcast %34 : vector<8x1xf32> to vector<8x5xf32>
    %36 = tpu.concatenate %26, %29, %32, %35 in 1 : vector<8x5xf32>, vector<8x5xf32>, vector<8x5xf32>, vector<8x5xf32> -> vector<8x20xf32>
    %c0_12 = arith.constant 0 : index
    %c0_13 = arith.constant 0 : index
    %c0_14 = arith.constant 0 : index
    %37 = vector.load %arg3[%c0_12, %c0_13, %c0_14] : memref<2x8x20xf32, #tpu.memory_space<vmem>>, vector<1x8x20xf32>
    %38 = vector.shape_cast %37 : vector<1x8x20xf32> to vector<8x20xf32>
    %39 = vector.shape_cast %36 : vector<8x20xf32> to vector<1x8x20xf32>
    tpu.vector_store %arg3[%c0_12, %c0_13, %c0_14], %39 {strides = array<i32>} : memref<2x8x20xf32, #tpu.memory_space<vmem>>, vector<1x8x20xf32>,
    %c1 = arith.constant 1 : index
    %c0_15 = arith.constant 0 : index
    %c0_16 = arith.constant 0 : index
    %40 = vector.load %arg0[%c1, %c0_15, %c0_16] : memref<2x4x20xf32, #tpu.memory_space<vmem>>, vector<1x4x20xf32>
    %41 = vector.shape_cast %40 : vector<1x4x20xf32> to vector<4x20xf32>
    %42 = vector.extract_strided_slice %41 {offsets = [0, 0], sizes = [4, 5], strides = [1, 1]} : vector<4x20xf32> to vector<4x5xf32>
    %cst_17 = arith.constant dense<0.000000e+00> : vector<4xf32>
    %43 = vector.multi_reduction <add>, %42, %cst_17 [1] : vector<4x5xf32> to vector<4xf32>
    %44 = vector.shape_cast %43 : vector<4xf32> to vector<4x1xf32>
    %45 = vector.extract_strided_slice %41 {offsets = [0, 5], sizes = [4, 5], strides = [1, 1]} : vector<4x20xf32> to vector<4x5xf32>
    %cst_18 = arith.constant dense<0.000000e+00> : vector<4xf32>
    %46 = vector.multi_reduction <add>, %45, %cst_18 [1] : vector<4x5xf32> to vector<4xf32>
    %47 = vector.shape_cast %46 : vector<4xf32> to vector<4x1xf32>
    %48 = vector.extract_strided_slice %41 {offsets = [0, 10], sizes = [4, 5], strides = [1, 1]} : vector<4x20xf32> to vector<4x5xf32>
    %cst_19 = arith.constant dense<0.000000e+00> : vector<4xf32>
    %49 = vector.multi_reduction <add>, %48, %cst_19 [1] : vector<4x5xf32> to vector<4xf32>
    %50 = vector.shape_cast %49 : vector<4xf32> to vector<4x1xf32>
    %51 = vector.extract_strided_slice %41 {offsets = [0, 15], sizes = [4, 5], strides = [1, 1]} : vector<4x20xf32> to vector<4x5xf32>
    %cst_20 = arith.constant dense<0.000000e+00> : vector<4xf32>
    %52 = vector.multi_reduction <add>, %51, %cst_20 [1] : vector<4x5xf32> to vector<4xf32>
    %53 = vector.shape_cast %52 : vector<4xf32> to vector<4x1xf32>
    %54 = tpu.concatenate %44, %47, %50, %53 in 1 : vector<4x1xf32>, vector<4x1xf32>, vector<4x1xf32>, vector<4x1xf32> -> vector<4x4xf32>
    %cst_21 = arith.constant 2.000000e-01 : f32
    %55 = vector.broadcast %cst_21 : f32 to vector<4x4xf32>
    %56 = arith.mulf %54, %55 : vector<4x4xf32>
    %cst_22 = arith.constant dense<0.000000e+00> : vector<8x4xf32>
    %57 = tpu.matmul %0, %56, %cst_22 {dimension_numbers = #tpu.dot_dimension_numbers<[1], [0], [0], [1], [0, 0, 1, 1], [], []>} : vector<8x4xf32>, vector<4x4xf32>, vector<8x4xf32> -> vector<8x4xf32>
    %58 = vector.broadcast %1 : vector<8x1xf32> to vector<8x4xf32>
    %59 = arith.addf %57, %58 : vector<8x4xf32>
    %cst_23 = arith.constant 0.000000e+00 : f32
    %60 = vector.broadcast %cst_23 : f32 to vector<8x4xf32>
    %61 = arith.maximumf %59, %60 : vector<8x4xf32>
    %62 = vector.extract_strided_slice %61 {offsets = [0, 0], sizes = [8, 1], strides = [1, 1]} : vector<8x4xf32> to vector<8x1xf32>
    %63 = vector.shape_cast %62 : vector<8x1xf32> to vector<8x1xf32>
    %64 = vector.broadcast %63 : vector<8x1xf32> to vector<8x5xf32>
    %65 = vector.extract_strided_slice %61 {offsets = [0, 1], sizes = [8, 1], strides = [1, 1]} : vector<8x4xf32> to vector<8x1xf32>
    %66 = vector.shape_cast %65 : vector<8x1xf32> to vector<8x1xf32>
    %67 = vector.broadcast %66 : vector<8x1xf32> to vector<8x5xf32>
    %68 = vector.extract_strided_slice %61 {offsets = [0, 2], sizes = [8, 1], strides = [1, 1]} : vector<8x4xf32> to vector<8x1xf32>
    %69 = vector.shape_cast %68 : vector<8x1xf32> to vector<8x1xf32>
    %70 = vector.broadcast %69 : vector<8x1xf32> to vector<8x5xf32>
    %71 = vector.extract_strided_slice %61 {offsets = [0, 3], sizes = [8, 1], strides = [1, 1]} : vector<8x4xf32> to vector<8x1xf32>
    %72 = vector.shape_cast %71 : vector<8x1xf32> to vector<8x1xf32>
    %73 = vector.broadcast %72 : vector<8x1xf32> to vector<8x5xf32>
    %74 = tpu.concatenate %64, %67, %70, %73 in 1 : vector<8x5xf32>, vector<8x5xf32>, vector<8x5xf32>, vector<8x5xf32> -> vector<8x20xf32>
    %c1_24 = arith.constant 1 : index
    %c0_25 = arith.constant 0 : index
    %c0_26 = arith.constant 0 : index
    %75 = vector.load %arg3[%c1_24, %c0_25, %c0_26] : memref<2x8x20xf32, #tpu.memory_space<vmem>>, vector<1x8x20xf32>
    %76 = vector.shape_cast %75 : vector<1x8x20xf32> to vector<8x20xf32>
    %77 = vector.shape_cast %74 : vector<8x20xf32> to vector<1x8x20xf32>
    tpu.vector_store %arg3[%c1_24, %c0_25, %c0_26], %77 {strides = array<i32>} : memref<2x8x20xf32, #tpu.memory_space<vmem>>, vector<1x8x20xf32>,
    return
  }
}

</mosaic_0001>

<bundles_post_ra>
// kernel: tpu_custom_call.1
= control target key start
LH: loop header
LB: loop body
LE: loop exit
PB: predicated region body
PF: predicated region fallthrough
CT: control target
= control target key end

     0   :  { %s362_s14 = smov 123   ;;  %s363_s15 = smov 118   ;;  %s428_s0 = inlined_call_operand.vmem [shape: f32[2,4,20], index: 0, kind: input, shape index: {}]   ;;  %s429_s1 = inlined_call_operand.vmem [shape: f32[8,4], index: 1, kind: input, shape index: {}]   ;;  %s430_s2 = inlined_call_operand.vmem [shape: f32[8,1], index: 2, kind: input, shape index: {}]   ;;  %s431_s3 = inlined_call_operand.hbm [shape: f32[2,8,20], index: 3, kind: output, shape index: {}]  }
   0x1   :  { %v17_v0 = vld [vmem:[%s428_s0] sm:$0xf] }
   0x2   :  { %23 = vrot.lane.b32.xlu0 %v17_v0, %s362_s14  ;;  %29 = vrot.lane.b32.xlu1 %v17_v0, %s363_s15 }
   0x3   :  { %8 = vsyncpa [#allocation3], 0  ;;  %v299_v1 = vld [vmem:[%s428_s0 + $0x4] sm:$0xf]  ;;  %s364_s18 = smov 113   ;;  %vm18_vm0 = vcmask 35840  }
   0x4   :  { %v19_v2 = vsel %vm18_vm0, %v17_v0, 0.0  ;;  %v159_v3 = vsel %vm18_vm0, %v299_v1, 0.0  ;;  %v365_v16 = vmov 0.0   ;;  %vm366_vm1 = vmmov 0   ;;  %v16_v17 = vld [vmem:[%s430_s2] sm:$0xff] }
   0x5   :  { %306 = vmatprep.subr.mxu0 %v365_v16  ;;  %311 = vmatprep.subr.mxu1 %v365_v16  ;;  %v367_v18 = vmov 0   ;;  %vm41_vm2 = vcmask 7168   ;;  %vm43_vm3 = vcmask 15360   ;;  %vm45_vm4 = vcmask 23552   ;;  %v15_v30 = vld [vmem:[%s429_s1] sm:$0xff]  ;;  %s371_s1 = smov [#allocation2]  }
   0x6   :  { %163 = vrot.lane.b32.xlu0 %v299_v1, %s362_s14  ;;  %169 = vrot.lane.b32.xlu1 %v299_v1, %s363_s15  ;;  %vm57_vm5 = vcmask 1043456   ;;  %vm53_vm6 = vcmask 31744   ;;  %v368_v36 = vmov 1   ;;  %v369_v44 = vmov 2   ;;  %s286_s21 = sshll.u32 %s371_s1, 4  ;;  %s287_s21 = int_to_ptr.vmem [resolvable:$true] %s286_s21 }
   0x7   :  { %308 = vmatprep.mubr.msk.f32.mxu0 %vm366_vm1, %v365_v16  ;;  %313 = vmatprep.mubr.msk.f32.mxu1 %vm366_vm1, %v365_v16  ;;  %v370_v45 = vmov 3   ;;  %vm149_vm7 = vcmask 39936   ;;  %vm151_vm8 = vcmask 80896   ;;  %vm153_vm9 = vcmask 121856   ;;  %s338_s22 = scalar_lea.vmem %s287_s21, 256  ;;  %p343_p1 = scmp.lt.s32.totalorder %s287_s21, %s287_s21 }
   0x8   :  { %328 = vset.pattern.permute.xlu1 %v367_v18  ;;  %329 = vset.pattern.permute.xlu0 %v367_v18  ;;  %vm155_vm10 = vcmask 162816   ;;  %p339_p0 = scmp.ne.s32.totalorder %s287_s21, %s338_s22  ;;  %p344_p2 = scmp.lt.s32.totalorder %s338_s22, %s338_s22 }
   0xa   :  { %35 = vrot.lane.b32.xlu0 %v17_v0, %s364_s18  ;;  %175 = vrot.lane.b32.xlu1 %v299_v1, %s364_s18  ;;  %p345_p3 = por %p344_p2, %p343_p1 }
   0xc   :  { %p346_p4 = pnand %p345_p3, %p339_p0 }
  0x29   :  { %20 = vadd.xlane.f32.xlu0 %v19_v2 }
  0x2d   :  { %160 = vadd.xlane.f32.xlu0 %v159_v3 }
  0x74   :  { %v24_v4 = vpop.permute.xlu0 %23  ;;  %v30_v5 = vpop.permute.xlu1 %29 }
  0x75   :  { %v26_v6 = vsel %vm18_vm0, %v24_v4, 0.0  ;;  %v32_v7 = vsel %vm18_vm0, %v30_v5, 0.0 }
  0x76   :  { %27 = vadd.xlane.f32.xlu1 %v26_v6 }
  0x78   :  { %v164_v8 = vpop.permute.xlu0 %163  ;;  %v170_v9 = vpop.permute.xlu1 %169 }
  0x79   :  { %v166_v10 = vsel %vm18_vm0, %v164_v8, 0.0  ;;  %v172_v11 = vsel %vm18_vm0, %v170_v9, 0.0 }
  0x7a   :  { %33 = vadd.xlane.f32.xlu1 %v32_v7  ;;  %167 = vadd.xlane.f32.xlu0 %v166_v10 }
  0x7c   :  { %v36_v12 = vpop.permute.xlu0 %35  ;;  %v176_v13 = vpop.permute.xlu1 %175 }
  0x7d   :  { %v38_v14 = vsel %vm18_vm0, %v36_v12, 0.0  ;;  %v178_v15 = vsel %vm18_vm0, %v176_v13, 0.0 }
  0x7e   :  { %39 = vadd.xlane.f32.xlu1 %v38_v14  ;;  %173 = vadd.xlane.f32.xlu0 %v172_v11 }
  0x82   :  { %179 = vadd.xlane.f32.xlu0 %v178_v15 }
  0x8f   :  { %50 = vperm.xlu1 %328, %v16_v17  }
  0x93   :  { %330 = vset.pattern.permute.xlu1 %v368_v36 }
  0xb6   :  { %v21_v19 = vpop.xlane.xlu0 %20 }
  0xba   :  { %v161_v20 = vpop.xlane.xlu0 %160 }
 0x103   :  { %v28_v21 = vpop.xlane.xlu1 %27 }
 0x104   :  { %v42_v24 = vsel %vm41_vm2, %v21_v19, %v28_v21 }
 0x107   :  { %v34_v22 = vpop.xlane.xlu1 %33  ;;  %v168_v23 = vpop.xlane.xlu0 %167 }
 0x108   :  { %v44_v25 = vsel %vm43_vm3, %v42_v24, %v34_v22  ;;  %v181_v31 = vsel %vm41_vm2, %v161_v20, %v168_v23 }
 0x10b   :  { %v40_v26 = vpop.xlane.xlu1 %39  ;;  %v174_v27 = vpop.xlane.xlu0 %173 }
 0x10c   :  { %v46_v28 = vsel %vm45_vm4, %v44_v25, %v40_v26  ;;  %v182_v32 = vsel %vm43_vm3, %v181_v31, %v174_v27 }
 0x10d   :  { %v47_v29 = vmul.f32 0.2, %v46_v28 }
 0x10f   :  { %307 = vmatpush3.msk.msra.mxu0 %vm57_vm5, %v47_v29  ;;  %v180_v33 = vpop.xlane.xlu0 %179  ;;  %v51_v37 = vpop.permute.xlu1 %50 }
 0x110   :  { %v183_v34 = vsel %vm45_vm4, %v182_v32, %v180_v33  ;;  %309 = vmatmul.mubr.msk.f32.vlgmr.msra.gmra.mrb[0].mxu0 %vm53_vm6, %v15_v30 }
 0x111   :  { %v184_v35 = vmul.f32 0.2, %v183_v34 }
 0x113   :  { %312 = vmatpush3.msk.msra.mxu1 %vm57_vm5, %v184_v35 }
 0x114   :  { %314 = vmatmul.mubr.msk.f32.vlgmr.msra.gmra.mrb[0].mxu1 %vm53_vm6, %v15_v30 }
 0x1e3   :  { %v127_v38 = vpop.f32.mrb[0].mxu0 }
 0x1e4   :  { %v128_v39 = vadd.f32 %v127_v38, %v51_v37  ;;  %v310_v40 = vpop.f32.mrb[1].mxu0 }
 0x1e6   :  { %v131_v41 = vmax.f32 %v128_v39, 0.0 }
 0x1e7   :  { %v254_v42 = vpop.f32.mrb[0].mxu1 }
 0x1e8   :  { %138 = vperm.xlu1 %330, %v131_v41   ;;  %134 = vperm.xlu0 %329, %v131_v41   ;;  %v315_v43 = vpop.f32.mrb[1].mxu1  ;;  %v255_v46 = vadd.f32 %v254_v42, %v51_v37 }
 0x1ea   :  { %v258_v47 = vmax.f32 %v255_v46, 0.0 }
 0x1ec   :  { %331 = vset.pattern.permute.xlu1 %v369_v44  ;;  %337 = vset.pattern.permute.xlu0 %v370_v45 }
 0x1ed   :  { %142 = vperm.xlu1 %331, %v131_v41  }
 0x1f1   :  { %332 = vset.pattern.permute.xlu1 %v370_v45 }
 0x1f2   :  { %146 = vperm.xlu1 %332, %v131_v41  }
 0x1f6   :  { %333 = vset.pattern.permute.xlu1 %v367_v18 }
 0x1f7   :  { %261 = vperm.xlu1 %333, %v258_v47  }
 0x1fb   :  { %334 = vset.pattern.permute.xlu1 %v368_v36 }
 0x1fc   :  { %265 = vperm.xlu1 %334, %v258_v47  }
 0x200   :  { %335 = vset.pattern.permute.xlu1 %v369_v44 }
 0x201   :  { %269 = vperm.xlu1 %335, %v258_v47  }
 0x205   :  { %336 = vset.pattern.permute.xlu1 %v370_v45 }
 0x206   :  { %273 = vperm.xlu1 %336, %v258_v47  }
 0x267   :  { %v139_v48 = vpop.permute.xlu1 %138  ;;  %v135_v50 = vpop.permute.xlu0 %134 }
 0x268   :  { %v150_v51 = vsel %vm149_vm7, %v135_v50, %v139_v48 }
 0x26c   :  { %v143_v49 = vpop.permute.xlu1 %142 }
 0x26d   :  { %v152_v52 = vsel %vm151_vm8, %v150_v51, %v143_v49 }
 0x271   :  { %v147_v53 = vpop.permute.xlu1 %146 }
 0x272   :  { %v154_v54 = vsel %vm153_vm9, %v152_v52, %v147_v53 }
 0x273   :  { %156 = vst.msk [vmem:[#allocation2] sm:$0xff] %vm155_vm10, %v154_v54 }
 0x276   :  { %v262_v55 = vpop.permute.xlu1 %261 }
 0x27b   :  { %v266_v56 = vpop.permute.xlu1 %265 }
 0x27c   :  { %v276_v58 = vsel %vm149_vm7, %v262_v55, %v266_v56 }
 0x280   :  { %v270_v57 = vpop.permute.xlu1 %269 }
 0x281   :  { %v277_v59 = vsel %vm151_vm8, %v276_v58, %v270_v57 }
 0x285   :  { %v274_v60 = vpop.permute.xlu1 %273 }
 0x286   :  { %v278_v61 = vsel %vm153_vm9, %v277_v59, %v274_v60 }
 0x287   :  { %280 = vst.msk [vmem:[#allocation2 + $0x8] sm:$0xff] %vm155_vm10, %v278_v61 }
 0x288   :  { %349 = shalt.err (!%p346_p4)
}
 0x289   :  { %s350_s25 = scalar_lea.hbm %s431_s3, 256 }
 0x28a   :  { %p351_p5 = scmp.ne.s32.totalorder %s431_s3, %s350_s25  ;;  %p354_p6 = scmp.lt.u32.totalorder %s350_s25, %s431_s3 }
 0x28c   :  { %p356_p7 = pnand %p354_p6, %p351_p5 }
 0x28e   :  { %359 = shalt.err (!%p356_p7)
}
 0x28f   :  { %s372_s30 = smov 128   ;;  %s373_s4 = smov 8  }
 0x290   :  { %292 = dma.vmem_to_hbm [thread:$0]  %s287_s21, 256, %s431_s3, [#allocation3], %s372_s30, %s372_s30, %s373_s4  }
 0x291   :  { %360 = dma.done.wait [#allocation3], 256  }
 0x292   :  { %361 = vsyncadd [#allocation3], 4294967040 }
 0x293   :  { %296 = vsyncpa [#allocation3], 1 }

</bundles_post_ra>
